<compile_context>
chip_gen: v5e
topology: v5e:2x2
jax: 0.10.0
libtpu: 0.0.40
codegen_flags: <defaults>
</compile_context>

<pallas_src>
import functools

import jax
import jax.numpy as jnp
from jax.experimental import pallas as pl
from jax.experimental.pallas import tpu as pltpu


# --------------------------------------------------------------------------
# Pallas kernels
# --------------------------------------------------------------------------

def _matmul_bias_act_kernel(a_ref, w_ref, b_ref, o_ref, *, apply_relu):
    """(tm, K) x (K, tn) MXU matmul block with fused bias add (+ ReLU)."""
    acc = jnp.dot(a_ref[...], w_ref[...], preferred_element_type=jnp.float32)
    acc = acc + b_ref[...]                      # (1, tn) broadcasts over rows
    if apply_relu:
        acc = jnp.maximum(acc, 0.0)
    o_ref[...] = acc.astype(o_ref.dtype)


def _max4_kernel(a_ref, b_ref, c_ref, d_ref, o_ref):
    """Elementwise max of the four 2x2-window corners (maxpool 2x2, stride 2)."""
    o_ref[...] = jnp.maximum(jnp.maximum(a_ref[...], b_ref[...]),
                             jnp.maximum(c_ref[...], d_ref[...]))


# --------------------------------------------------------------------------
# Pallas wrappers
# --------------------------------------------------------------------------

def _matmul_bias_act(a, w, b2d, *, apply_relu):
    """out = act(a @ w + b); a:(M,K) w:(K,N) b2d:(1,N)."""
    M, K = a.shape
    _, N = w.shape
    tm = M if M <= 256 else 256          # full-extent or 8-aligned row tiles
    tn = N if N <= 128 else 128          # lane-dense column tiles
    grid = (pl.cdiv(M, tm), pl.cdiv(N, tn))
    kernel = functools.partial(_matmul_bias_act_kernel, apply_relu=apply_relu)
    return pl.pallas_call(
        kernel,
        out_shape=jax.ShapeDtypeStruct((M, N), a.dtype),
        grid=grid,
        in_specs=[
            pl.BlockSpec((tm, K), lambda i, j: (i, 0)),   # patches (reused over j)
            pl.BlockSpec((K, tn), lambda i, j: (0, j)),   # weights (streamed)
            pl.BlockSpec((1, tn), lambda i, j: (0, j)),   # bias row
        ],
        out_specs=pl.BlockSpec((tm, tn), lambda i, j: (i, j)),
        compiler_params=pltpu.CompilerParams(
            dimension_semantics=("parallel", "parallel")),
    )(a, w, b2d)


def _im2col_3x3(x):
    """(B,H,W,C) NHWC -> (B*H*W, 9*C) patches for a SAME-padded 3x3 conv."""
    B, H, W, C = x.shape
    xp = jnp.pad(x, ((0, 0), (1, 1), (1, 1), (0, 0)))
    taps = [xp[:, dy:dy + H, dx:dx + W, :] for dy in range(3) for dx in range(3)]
    return jnp.concatenate(taps, axis=-1).reshape(B * H * W, 9 * C)


def conv3x3_same(x, w_mat, b, *, apply_relu):
    """3x3 conv, padding=1, stride=1, NHWC; w_mat:(9*Cin, Cout), b:(Cout,)."""
    B, H, W, _ = x.shape
    K, N = w_mat.shape
    patches = _im2col_3x3(x)
    # Zero-pad the contraction dim to a lane multiple for aligned MXU blocks.
    Kp = ((K + 127) // 128) * 128
    if Kp != K:
        patches = jnp.pad(patches, ((0, 0), (0, Kp - K)))
        w_mat = jnp.pad(w_mat, ((0, Kp - K), (0, 0)))
    out = _matmul_bias_act(patches, w_mat, b.reshape(1, N), apply_relu=apply_relu)
    return out.reshape(B, H, W, N)


def maxpool2x2(x):
    """MaxPool2d(kernel=2, stride=2) on NHWC via a 4-way elementwise-max kernel."""
    B, H, W, C = x.shape
    Ho, Wo = H // 2, W // 2
    x = x[:, :2 * Ho, :2 * Wo, :]
    corners = [x[:, dy::2, dx::2, :].reshape(B * Ho * Wo, C)
               for dy in range(2) for dx in range(2)]
    rows = B * Ho * Wo
    tm = rows if rows <= 512 else 512
    grid = (pl.cdiv(rows, tm),)
    spec = pl.BlockSpec((tm, C), lambda i: (i, 0))
    out = pl.pallas_call(
        _max4_kernel,
        out_shape=jax.ShapeDtypeStruct((rows, C), x.dtype),
        grid=grid,
        in_specs=[spec, spec, spec, spec],
        out_specs=spec,
        compiler_params=pltpu.CompilerParams(dimension_semantics=("parallel",)),
    )(*corners)
    return out.reshape(B, Ho, Wo, C)


# --------------------------------------------------------------------------
# VGG16 features[:-2] parameters (deterministic, in-script)
# --------------------------------------------------------------------------

_VGG16_CFG = (64, 64, "M", 128, 128, "M", 256, 256, 256, "M",
              512, 512, 512, "M", 512, 512, 512)   # [:-2] drops final ReLU+MaxPool


def build_vgg16_features_minus2_params(key):
    params = []
    cin = 3
    n_conv = sum(1 for c in _VGG16_CFG if c != "M")
    conv_idx = 0
    for c in _VGG16_CFG:
        if c == "M":
            params.append(("pool", None, None, None))
            continue
        conv_idx += 1
        key, kw, kb = jax.random.split(key, 3)
        std = (2.0 / (9 * cin)) ** 0.5
        w = (jax.random.normal(kw, (3, 3, cin, c), jnp.float32) * std).reshape(9 * cin, c)
        b = jax.random.normal(kb, (c,), jnp.float32) * 0.05
        relu = conv_idx < n_conv        # last conv of features[:-2] has no ReLU
        params.append(("conv", w, b, relu))
        cin = c
    return params


# --------------------------------------------------------------------------
# Forward (Pallas) and pure-JAX reference
# --------------------------------------------------------------------------

def _run_stack(x, params, conv_fn, pool_fn):
    B, d1, gx, gy, d2 = x.shape
    assert d1 * d2 == 3, "reshape(B, 3, g_x, g_y) requires d1*d2 == 3"
    h = x.reshape(B, 3, gx, gy)             # == torch x.reshape(B, 3, g_x, g_y)
    h = jnp.transpose(h, (0, 2, 3, 1))      # NHWC: channels on the lane axis
    for kind, w, b, relu in params:
        if kind == "conv":
            h = conv_fn(h, w, b, apply_relu=relu)
        else:
            h = pool_fn(h)
    return jnp.transpose(h, (0, 3, 1, 2))   # back to NCHW like the torch module


def imagenet_feat_forward(x, params):
    return _run_stack(x, params, conv3x3_same, maxpool2x2)


def _conv3x3_same_ref(x, w_mat, b, *, apply_relu):
    B, H, W, _ = x.shape
    _, N = w_mat.shape
    out = jnp.dot(_im2col_3x3(x), w_mat, preferred_element_type=jnp.float32) + b[None, :]
    if apply_relu:
        out = jnp.maximum(out, 0.0)
    return out.reshape(B, H, W, N)


def _maxpool2x2_ref(x):
    B, H, W, C = x.shape
    return jnp.max(x.reshape(B, H // 2, 2, W // 2, 2, C), axis=(2, 4))


def imagenet_feat_forward_ref(x, params):
    return _run_stack(x, params, _conv3x3_same_ref, _maxpool2x2_ref)


# --------------------------------------------------------------------------
if __name__ == "__main__":
    key = jax.random.PRNGKey(0)
    kx, kp = jax.random.split(key)

    # (B, d1, g_x, g_y, d2) with d1*d2 == 3 channels, as the module's forward implies.
    x = jax.random.normal(kx, (2, 3, 16, 16, 1), dtype=jnp.float32)
    params = build_vgg16_features_minus2_params(kp)

    y = jax.block_until_ready(imagenet_feat_forward(x, params))
    ref = jax.block_until_ready(imagenet_feat_forward_ref(x, params))

    # 16x16 input -> 4 maxpools -> 1x1 spatial, 512 channels, NCHW like torch.
    assert y.shape == (2, 512, 1, 1), y.shape
    assert y.dtype == jnp.float32

    err = float(jnp.max(jnp.abs(y - ref)))
    scale = float(jnp.max(jnp.abs(ref))) + 1e-6
    assert err / scale < 0.1, (err, scale)

    print("KERNEL_OK")
</pallas_src>

<mosaic_0001>
module attributes {stable_mosaic.version = 11 : i64} {
  func.func @_matmul_bias_act_kernel(%arg0: i32, %arg1: i32, %arg2: memref<256x128xf32, #tpu.memory_space<vmem>>, %arg3: memref<128x64xf32, #tpu.memory_space<vmem>>, %arg4: memref<1x64xf32, #tpu.memory_space<vmem>>, %arg5: memref<256x64xf32, #tpu.memory_space<vmem>>) attributes {dimension_semantics = [#tpu.dimension_semantics<parallel>, #tpu.dimension_semantics<parallel>], iteration_bounds = array<i64: 2, 1>, scalar_prefetch = 0 : i64, scratch_operands = 0 : i64, tpu.core_type = #tpu.core_type<tc>, window_params = [{transform_indices = @transform_0, window_bounds = array<i64: 256, 128>}, {transform_indices = @transform_1, window_bounds = array<i64: 128, 64>}, {transform_indices = @transform_2, window_bounds = array<i64: 1, 64>}, {transform_indices = @transform_3, window_bounds = array<i64: 256, 64>}]} {
    %c0 = arith.constant 0 : index
    %c0_0 = arith.constant 0 : index
    %0 = vector.load %arg2[%c0, %c0_0] : memref<256x128xf32, #tpu.memory_space<vmem>>, vector<256x128xf32>
    %c0_1 = arith.constant 0 : index
    %c0_2 = arith.constant 0 : index
    %1 = vector.load %arg3[%c0_1, %c0_2] : memref<128x64xf32, #tpu.memory_space<vmem>>, vector<128x64xf32>
    %cst = arith.constant dense<0.000000e+00> : vector<256x64xf32>
    %2 = tpu.matmul %0, %1, %cst {dimension_numbers = #tpu.dot_dimension_numbers<[1], [0], [0], [1], [0, 0, 1, 1], [], []>} : vector<256x128xf32>, vector<128x64xf32>, vector<256x64xf32> -> vector<256x64xf32>
    %c0_3 = arith.constant 0 : index
    %c0_4 = arith.constant 0 : index
    %3 = vector.load %arg4[%c0_3, %c0_4] : memref<1x64xf32, #tpu.memory_space<vmem>>, vector<1x64xf32>
    %4 = vector.broadcast %3 : vector<1x64xf32> to vector<256x64xf32>
    %5 = arith.addf %2, %4 : vector<256x64xf32>
    %cst_5 = arith.constant 0.000000e+00 : f32
    %6 = vector.broadcast %cst_5 : f32 to vector<256x64xf32>
    %7 = arith.maximumf %5, %6 : vector<256x64xf32>
    %c0_6 = arith.constant 0 : index
    %c0_7 = arith.constant 0 : index
    %8 = vector.load %arg5[%c0_6, %c0_7] : memref<256x64xf32, #tpu.memory_space<vmem>>, vector<256x64xf32>
    tpu.vector_store %arg5[%c0_6, %c0_7], %7 {strides = array<i32>} : memref<256x64xf32, #tpu.memory_space<vmem>>, vector<256x64xf32>,
    return
  }
  func.func @transform_0(%arg0: i32, %arg1: i32) -> (i32, i32) {
    %c0_i32 = arith.constant 0 : i32
    %c0_i32_0 = arith.constant 0 : i32
    return %arg0, %c0_i32 : i32, i32
  }
  func.func @transform_1(%arg0: i32, %arg1: i32) -> (i32, i32) {
    %c0_i32 = arith.constant 0 : i32
    %c0_i32_0 = arith.constant 0 : i32
    return %c0_i32, %arg1 : i32, i32
  }
  func.func @transform_2(%arg0: i32, %arg1: i32) -> (i32, i32) {
    %c0_i32 = arith.constant 0 : i32
    %c0_i32_0 = arith.constant 0 : i32
    return %c0_i32, %arg1 : i32, i32
  }
  func.func @transform_3(%arg0: i32, %arg1: i32) -> (i32, i32) {
    %c0_i32 = arith.constant 0 : i32
    return %arg0, %arg1 : i32, i32
  }
}

</mosaic_0001>

<bundles_post_ra>
// kernel: tpu_custom_call.1
= control target key start
LH: loop header
LB: loop body
LE: loop exit
PB: predicated region body
PF: predicated region fallthrough
CT: control target
= control target key end

     0   :  { %8 = vsyncpa [#allocation3], 0  ;;  %s1087_s0 = inlined_call_operand.hbm [shape: f32[512,128], index: 0, kind: input, shape index: {}]   ;;  %s1088_s1 = inlined_call_operand.vmem [shape: f32[128,64], index: 1, kind: input, shape index: {}]   ;;  %s1089_s2 = inlined_call_operand.vmem [shape: f32[1,64], index: 2, kind: input, shape index: {}]   ;;  %s1090_s3 = inlined_call_operand.vmem [shape: f32[512,64], index: 3, kind: output, shape index: {}]  }
   0x1   :  { %10 = vsyncpa [#allocation3 + $0x1], 0  ;;  %s815_s12 = smov 0   ;;  %s817_s13 = smov 0  }
   0x2   :  { %s819_s14 = smov 0   ;;  %s821_s15 = smov 0  }
   0x3   :  { %s823_s16 = smov 0   ;;  %s825_s17 = smov 0  }
   0x4 LB: > { %s589_s18 = sadd.s32 4294967295, %s791_s17   ;;  %s28_s19 = sadd.s32 1, %s787_s16  ;;  %s791_s17 = sphi %s825_s17, %s16_s17   ;;  %s787_s16 = sphi %s823_s16, %s1097_s16   ;;  %s783_s15 = sphi %s821_s15, %s1096_s15   ;;  %s779_s14 = sphi %s819_s14, %s1095_s14   ;;  %s775_s13 = sphi %s817_s13, %s1094_s13   ;;  %s771_s12 = sphi %s815_s12, %s1093_s12  }
   0x5   : > { %p30_p0 = scmp.ge.s32.totalorder %s28_s19, 2  ;;  %s35_s20 = sadd.s32 1, %s779_s14 }
   0x6   : > { %p42_p1 = scmp.ne.s32.totalorder %s779_s14, %s775_s13  ;;  %p43_p2 = scmp.eq.s32.totalorder %s791_s17, 0 }
   0x7   : > { %s1099_s19 = smov (%p30_p0, %s28_s19), 0  ;;  %p48_p4 = scmp.ne.s32.totalorder %s775_s13, %s771_s12 }
   0x8   : > { %p851_p3 = por %p43_p2, %p42_p1  ;;  %s32_s22 = ssub.s32 %s787_s16, %s1099_s19 }
   0x9   : > { %p49_p5 = scmp.eq.s32.totalorder %s589_s18, 0  ;;  %p33_p6 = scmp.eq.s32.totalorder %s32_s22, 0 }
   0xa   : > { %p659_p8 = scmp.lt.s32.totalorder %s791_s17, 2  ;;  %s165_s25 = sand.u32 1, %s779_s14  }
   0xb   : > { %p858_p7 = por %p49_p5, %p48_p4  ;;  %s604_s26 = sshll.u32 %s787_s16, 8 }
   0xc   : > { %s864_s24 = scalar_select %p33_p6, %s779_s14, %s35_s20  }
   0xd   : > { %s595_s27 = sshll.u32 %s165_s25, 8  ;;  %s174_s30 = scalar_lea.hbm %s1087_s0, %s604_s26 }
   0xe   : > { %s175_s4 = sshll.u32 %s174_s30, 4  ;;  %s169_s5 = scalar_lea.vmem [#allocation2], %s595_s27  ;;  %s176_s4 = int_to_ptr.hbm [resolvable:$true] %s175_s4 }
   0xf   : > { %s177_s6 = sshll.u32 %s169_s5, 4  ;;  %p656_p9 = pnand %p659_p8, %p851_p3  ;;  %s178_s6 = int_to_ptr.vmem [resolvable:$true] %s177_s6 }
  0x10   : > { %p598_p10 = scmp.ge.s32.totalorder %s791_s17, 1  ;;  %p185_p11 = scmp.lt.s32.totalorder %s791_s17, 3 }
  0x11   : > { %s166_s7 = scalar_lea.sflag [#allocation3], %s165_s25  ;;  %s793_s8 = smov 128  }
  0x12   : > { %s794_s9 = smov 8   ;;  %p186_p12 = pnand %p598_p10, %p185_p11 }
  0x13   : > { %658 = dma.hbm_to_vmem [thread:$0]  (!%p656_p9), %s176_s4, 4096, %s178_s6, %s166_s7, %s793_s8, %s793_s8, %s794_s9  }
  0x14   : > { %189 = sbr.rel (%p186_p12) target bundleno = 252 (0xfc), region = 32  ;;  %s191_s10 = sand.u32 (!%p186_p12), 1, %s775_s13  }
  0x15   : > { %s599_s11 = sshll.u32 (!%p186_p12), %s191_s10, 8  ;;  %s192_s12 = scalar_lea.sflag (!%p186_p12), [#allocation3], %s191_s10 }
  0x16   : > { %s876_s18 = scalar_lea.vmem (!%p186_p12), [#allocation2], %s599_s11 }
  0x19   : > { %766 = dma.done.wait (%p858_p7), %s192_s12, 4096  }
  0x1a   : > { %768 = vsyncadd (%p858_p7), %s192_s12, 4294963200  ;;  %v293_v0 = vld [vmem:[%s1088_s1 + $0x78] sm:$0xff]  ;;  %v292_v1 = vld [vmem:[%s1088_s1 + $0x70] sm:$0xff]  ;;  %s600_s7 = sshll.u32 %s783_s15, 5  ;;  %vm443_vm0 = vcmask 523264  }
  0x1b   : > { %606 = vmatpush.msra.mxu2 %v293_v0  ;;  %607 = vmatpush.msra.mxu3 %v293_v0  ;;  %v291_v2 = vld [vmem:[%s1088_s1 + $0x68] sm:$0xff]  ;;  %v290_v3 = vld [vmem:[%s1088_s1 + $0x60] sm:$0xff]  ;;  %v289_v4 = vld [vmem:[%s1088_s1 + $0x58] sm:$0xff]  ;;  %p238_p13 = scmp.lt.s32.totalorder %s600_s7, 63 }
  0x1c   : > { %298 = vmatpush.msra.mxu0 %v293_v0  ;;  %605 = vmatpush.msra.mxu1 %v293_v0  ;;  %v288_v5 = vld [vmem:[%s1088_s1 + $0x50] sm:$0xff]  ;;  %v287_v6 = vld [vmem:[%s1088_s1 + $0x48] sm:$0xff]  ;;  %v286_v7 = vld [vmem:[%s1088_s1 + $0x40] sm:$0xff] }
  0x1d   : > { %609 = vmatpush.msra.mxu2 %v292_v1  ;;  %610 = vmatpush.msra.mxu3 %v292_v1  ;;  %v285_v8 = vld [vmem:[%s1088_s1 + $0x38] sm:$0xff]  ;;  %v284_v9 = vld [vmem:[%s1088_s1 + $0x30] sm:$0xff]  ;;  %v283_v10 = vld [vmem:[%s1088_s1 + $0x28] sm:$0xff]  ;;  %s1101_s7 = smov (!%p238_p13, %s600_s7), 63 }
  0x1e   : > { %299 = vmatpush.msra.mxu0 %v292_v1  ;;  %608 = vmatpush.msra.mxu1 %v292_v1  ;;  %v282_v11 = vld [vmem:[%s1088_s1 + $0x20] sm:$0xff]  ;;  %v281_v12 = vld [vmem:[%s1088_s1 + $0x18] sm:$0xff]  ;;  %v280_v13 = vld [vmem:[%s1088_s1 + $0x10] sm:$0xff]  ;;  %s601_s10 = sshll.u32 %s1101_s7, 3 }
  0x1f   : > { %612 = vmatpush.msra.mxu2 %v291_v2  ;;  %613 = vmatpush.msra.mxu3 %v291_v2  ;;  %v279_v14 = vld [vmem:[%s1088_s1 + $0x8] sm:$0xff]  ;;  %v278_v15 = vld [vmem:[%s1088_s1] sm:$0xff]  ;;  %v264_v24 = vld [vmem:[%s876_s18 + $0x90] sm:$0xff]  ;;  %s973_s12 = scalar_lea.vmem %s1090_s3, %s601_s10 }
  0x20   : > { %300 = vmatpush.msra.mxu0 %v291_v2  ;;  %611 = vmatpush.msra.mxu1 %v291_v2  ;;  %v262_v16 = vld [vmem:[%s876_s18 + $0x80] sm:$0xff]  ;;  %v263_v20 = vld [vmem:[%s876_s18 + $0x88] sm:$0xff]  ;;  %v272_v25 = vld [vmem:[%s876_s18 + $0xd0] sm:$0xff] }
  0x21   : > { %615 = vmatpush.msra.mxu2 %v290_v3  ;;  %616 = vmatpush.msra.mxu3 %v290_v3  ;;  %v270_v17 = vld [vmem:[%s876_s18 + $0xc0] sm:$0xff]  ;;  %v271_v21 = vld [vmem:[%s876_s18 + $0xc8] sm:$0xff]  ;;  %v248_v26 = vld [vmem:[%s876_s18 + $0x10] sm:$0xff] }
  0x22   : > { %301 = vmatpush.msra.mxu0 %v290_v3  ;;  %614 = vmatpush.msra.mxu1 %v290_v3  ;;  %v246_v18 = vld [vmem:[%s876_s18] sm:$0xff]  ;;  %v247_v22 = vld [vmem:[%s876_s18 + $0x8] sm:$0xff]  ;;  %v256_v27 = vld [vmem:[%s876_s18 + $0x50] sm:$0xff] }
  0x23   : > { %618 = vmatpush.msra.mxu2 %v289_v4  ;;  %619 = vmatpush.msra.mxu3 %v289_v4  ;;  %v254_v19 = vld [vmem:[%s876_s18 + $0x40] sm:$0xff]  ;;  %v255_v23 = vld [vmem:[%s876_s18 + $0x48] sm:$0xff]  ;;  %v265_v28 = vld [vmem:[%s876_s18 + $0x98] sm:$0xff] }
  0x24   : > { %302 = vmatpush.msra.mxu0 %v289_v4  ;;  %617 = vmatpush.msra.mxu1 %v289_v4  ;;  %v273_v29 = vld [vmem:[%s876_s18 + $0xd8] sm:$0xff]  ;;  %v266_v32 = vld [vmem:[%s876_s18 + $0xa0] sm:$0xff]  ;;  %v267_v36 = vld [vmem:[%s876_s18 + $0xa8] sm:$0xff] }
  0x25   : > { %621 = vmatpush.msra.mxu2 %v288_v5  ;;  %622 = vmatpush.msra.mxu3 %v288_v5  ;;  %v249_v30 = vld [vmem:[%s876_s18 + $0x18] sm:$0xff]  ;;  %v274_v33 = vld [vmem:[%s876_s18 + $0xe0] sm:$0xff]  ;;  %v275_v37 = vld [vmem:[%s876_s18 + $0xe8] sm:$0xff] }
  0x26   : > { %303 = vmatpush.msra.mxu0 %v288_v5  ;;  %620 = vmatpush.msra.mxu1 %v288_v5  ;;  %v257_v31 = vld [vmem:[%s876_s18 + $0x58] sm:$0xff]  ;;  %v250_v34 = vld [vmem:[%s876_s18 + $0x20] sm:$0xff]  ;;  %v251_v38 = vld [vmem:[%s876_s18 + $0x28] sm:$0xff] }
  0x27   : > { %624 = vmatpush.msra.mxu2 %v287_v6  ;;  %625 = vmatpush.msra.mxu3 %v287_v6  ;;  %v258_v35 = vld [vmem:[%s876_s18 + $0x60] sm:$0xff]  ;;  %v259_v39 = vld [vmem:[%s876_s18 + $0x68] sm:$0xff]  ;;  %v268_v40 = vld [vmem:[%s876_s18 + $0xb0] sm:$0xff] }
  0x28   : > { %304 = vmatpush.msra.mxu0 %v287_v6  ;;  %623 = vmatpush.msra.mxu1 %v287_v6  ;;  %v276_v41 = vld [vmem:[%s876_s18 + $0xf0] sm:$0xff]  ;;  %v269_v44 = vld [vmem:[%s876_s18 + $0xb8] sm:$0xff]  ;;  %v966_v48 = vld [vmem:[%s1089_s2] ss:$0 sm:$0xff] }
  0x29   : > { %627 = vmatpush.msra.mxu2 %v286_v7  ;;  %628 = vmatpush.msra.mxu3 %v286_v7  ;;  %v252_v42 = vld [vmem:[%s876_s18 + $0x30] sm:$0xff]  ;;  %v277_v45 = vld [vmem:[%s876_s18 + $0xf8] sm:$0xff] }
  0x2a   : > { %305 = vmatpush.msra.mxu0 %v286_v7  ;;  %626 = vmatpush.msra.mxu1 %v286_v7  ;;  %v260_v43 = vld [vmem:[%s876_s18 + $0x70] sm:$0xff]  ;;  %v253_v46 = vld [vmem:[%s876_s18 + $0x38] sm:$0xff] }
  0x2b   : > { %630 = vmatpush.msra.mxu2 %v285_v8  ;;  %631 = vmatpush.msra.mxu3 %v285_v8  ;;  %v261_v47 = vld [vmem:[%s876_s18 + $0x78] sm:$0xff] }
  0x2c   : > { %306 = vmatpush.msra.mxu0 %v285_v8  ;;  %629 = vmatpush.msra.mxu1 %v285_v8 }
  0x2d   : > { %633 = vmatpush.msra.mxu2 %v284_v9  ;;  %634 = vmatpush.msra.mxu3 %v284_v9 }
  0x2e   : > { %307 = vmatpush.msra.mxu0 %v284_v9  ;;  %632 = vmatpush.msra.mxu1 %v284_v9 }
  0x2f   : > { %636 = vmatpush.msra.mxu2 %v283_v10  ;;  %637 = vmatpush.msra.mxu3 %v283_v10 }
  0x30   : > { %308 = vmatpush.msra.mxu0 %v283_v10  ;;  %635 = vmatpush.msra.mxu1 %v283_v10 }
  0x31   : > { %639 = vmatpush.msra.mxu2 %v282_v11  ;;  %640 = vmatpush.msra.mxu3 %v282_v11 }
  0x32   : > { %309 = vmatpush.msra.mxu0 %v282_v11  ;;  %638 = vmatpush.msra.mxu1 %v282_v11 }
  0x33   : > { %642 = vmatpush.msra.mxu2 %v281_v12  ;;  %643 = vmatpush.msra.mxu3 %v281_v12 }
  0x34   : > { %310 = vmatpush.msra.mxu0 %v281_v12  ;;  %641 = vmatpush.msra.mxu1 %v281_v12 }
  0x35   : > { %645 = vmatpush.msra.mxu2 %v280_v13  ;;  %646 = vmatpush.msra.mxu3 %v280_v13 }
  0x36   : > { %311 = vmatpush.msra.mxu0 %v280_v13  ;;  %644 = vmatpush.msra.mxu1 %v280_v13 }
  0x37   : > { %648 = vmatpush.msra.mxu2 %v279_v14  ;;  %649 = vmatpush.msra.mxu3 %v279_v14 }
  0x38   : > { %312 = vmatpush.msra.mxu0 %v279_v14  ;;  %647 = vmatpush.msra.mxu1 %v279_v14 }
  0x39   : > { %651 = vmatpush.msra.mxu2 %v278_v15  ;;  %652 = vmatpush.msra.mxu3 %v278_v15 }
  0x3a   : > { %362 = vmatmul.f32.vlgmr.msra.gmra.mxu2 %v262_v16  ;;  %386 = vmatmul.f32.vlgmr.msra.gmra.mxu3 %v270_v17 }
  0x3b   : > { %313 = vmatpush.msra.mxu0 %v278_v15  ;;  %650 = vmatpush.msra.mxu1 %v278_v15 }
  0x3c   : > { %314 = vmatmul.f32.vlgmr.msra.gmra.mxu0 %v246_v18  ;;  %338 = vmatmul.f32.vlgmr.msra.gmra.mxu1 %v254_v19 }
  0x42   : > { %365 = vmatmul.f32.gmra.mxu2 %v263_v20  ;;  %389 = vmatmul.f32.gmra.mxu3 %v271_v21 }
  0x44   : > { %317 = vmatmul.f32.gmra.mxu0 %v247_v22  ;;  %341 = vmatmul.f32.gmra.mxu1 %v255_v23 }
  0x4a   : > { %368 = vmatmul.f32.gmra.mxu2 %v264_v24  ;;  %392 = vmatmul.f32.gmra.mxu3 %v272_v25 }
  0x4c   : > { %320 = vmatmul.f32.gmra.mxu0 %v248_v26  ;;  %344 = vmatmul.f32.gmra.mxu1 %v256_v27 }
  0x52   : > { %371 = vmatmul.f32.gmra.mxu2 %v265_v28  ;;  %395 = vmatmul.f32.gmra.mxu3 %v273_v29 }
  0x54   : > { %323 = vmatmul.f32.gmra.mxu0 %v249_v30  ;;  %347 = vmatmul.f32.gmra.mxu1 %v257_v31 }
  0x5a   : > { %374 = vmatmul.f32.gmra.mxu2 %v266_v32  ;;  %398 = vmatmul.f32.gmra.mxu3 %v274_v33 }
  0x5c   : > { %326 = vmatmul.f32.gmra.mxu0 %v250_v34  ;;  %350 = vmatmul.f32.gmra.mxu1 %v258_v35 }
  0x62   : > { %377 = vmatmul.f32.gmra.mxu2 %v267_v36  ;;  %401 = vmatmul.f32.gmra.mxu3 %v275_v37 }
  0x64   : > { %329 = vmatmul.f32.gmra.mxu0 %v251_v38  ;;  %353 = vmatmul.f32.gmra.mxu1 %v259_v39 }
  0x6a   : > { %380 = vmatmul.f32.gmra.mxu2 %v268_v40  ;;  %404 = vmatmul.f32.gmra.mxu3 %v276_v41 }
  0x6c   : > { %332 = vmatmul.f32.gmra.mxu0 %v252_v42  ;;  %356 = vmatmul.f32.gmra.mxu1 %v260_v43 }
  0x72   : > { %383 = vmatmul.f32.gmra.mxu2 %v269_v44  ;;  %407 = vmatmul.f32.gmra.mxu3 %v277_v45 }
  0x74   : > { %335 = vmatmul.f32.gmra.mxu0 %v253_v46  ;;  %359 = vmatmul.f32.gmra.mxu1 %v261_v47 }
  0xb9   : > { %v315_v49 = vpop.f32.mrf.mxu0  ;;  %v339_v50 = vpop.f32.mrf.mxu1 }
  0xba   : > { %v316_v51 = vadd.f32 %v966_v48, %v315_v49  ;;  %v340_v52 = vadd.f32 %v966_v48, %v339_v50 }
  0xbc   : > { %v411_v53 = vmax.f32 %v316_v51, 0.0  ;;  %v419_v54 = vmax.f32 %v340_v52, 0.0 }
  0xbd   : > { %v363_v55 = vpop.f32.mrf.mxu2  ;;  %v387_v56 = vpop.f32.mrf.mxu3 }
  0xbe   : > { %444 = vst.msk [vmem:[%s973_s12] sm:$0xff] %vm443_vm0, %v411_v53  ;;  %v364_v57 = vadd.f32 %v966_v48, %v363_v55  ;;  %v388_v58 = vadd.f32 %v966_v48, %v387_v56 }
  0xbf   : > { %452 = vst.msk [vmem:[%s973_s12 + $0x40] sm:$0xff] %vm443_vm0, %v419_v54 }
  0xc0   : > { %v427_v59 = vmax.f32 %v364_v57, 0.0  ;;  %v435_v60 = vmax.f32 %v388_v58, 0.0 }
  0xc1   : > { %v318_v61 = vpop.f32.mrf.mxu0  ;;  %v342_v62 = vpop.f32.mrf.mxu1 }
  0xc2   : > { %460 = vst.msk [vmem:[%s973_s12 + $0x80] sm:$0xff] %vm443_vm0, %v427_v59  ;;  %v319_v63 = vadd.f32 %v966_v48, %v318_v61  ;;  %v343_v0 = vadd.f32 %v966_v48, %v342_v62 }
  0xc3   : > { %468 = vst.msk [vmem:[%s973_s12 + $0xc0] sm:$0xff] %vm443_vm0, %v435_v60 }
  0xc4   : > { %v412_v1 = vmax.f32 %v319_v63, 0.0  ;;  %v420_v2 = vmax.f32 %v343_v0, 0.0 }
  0xc5   : > { %v366_v3 = vpop.f32.mrf.mxu2  ;;  %v390_v4 = vpop.f32.mrf.mxu3 }
  0xc6   : > { %445 = vst.msk [vmem:[%s973_s12 + $0x8] sm:$0xff] %vm443_vm0, %v412_v1  ;;  %v367_v5 = vadd.f32 %v966_v48, %v366_v3  ;;  %v391_v6 = vadd.f32 %v966_v48, %v390_v4 }
  0xc7   : > { %453 = vst.msk [vmem:[%s973_s12 + $0x48] sm:$0xff] %vm443_vm0, %v420_v2 }
  0xc8   : > { %v428_v7 = vmax.f32 %v367_v5, 0.0  ;;  %v436_v8 = vmax.f32 %v391_v6, 0.0 }
  0xc9   : > { %v321_v9 = vpop.f32.mrf.mxu0  ;;  %v345_v10 = vpop.f32.mrf.mxu1 }
  0xca   : > { %461 = vst.msk [vmem:[%s973_s12 + $0x88] sm:$0xff] %vm443_vm0, %v428_v7  ;;  %v322_v11 = vadd.f32 %v966_v48, %v321_v9  ;;  %v346_v12 = vadd.f32 %v966_v48, %v345_v10 }
  0xcb   : > { %469 = vst.msk [vmem:[%s973_s12 + $0xc8] sm:$0xff] %vm443_vm0, %v436_v8 }
  0xcc   : > { %v413_v13 = vmax.f32 %v322_v11, 0.0  ;;  %v421_v14 = vmax.f32 %v346_v12, 0.0 }
  0xcd   : > { %v369_v15 = vpop.f32.mrf.mxu2  ;;  %v393_v16 = vpop.f32.mrf.mxu3 }
  0xce   : > { %446 = vst.msk [vmem:[%s973_s12 + $0x10] sm:$0xff] %vm443_vm0, %v413_v13  ;;  %v370_v17 = vadd.f32 %v966_v48, %v369_v15  ;;  %v394_v18 = vadd.f32 %v966_v48, %v393_v16 }
  0xcf   : > { %454 = vst.msk [vmem:[%s973_s12 + $0x50] sm:$0xff] %vm443_vm0, %v421_v14 }
  0xd0   : > { %v429_v19 = vmax.f32 %v370_v17, 0.0  ;;  %v437_v20 = vmax.f32 %v394_v18, 0.0 }
  0xd1   : > { %v324_v21 = vpop.f32.mrf.mxu0  ;;  %v348_v22 = vpop.f32.mrf.mxu1 }
  0xd2   : > { %462 = vst.msk [vmem:[%s973_s12 + $0x90] sm:$0xff] %vm443_vm0, %v429_v19  ;;  %v325_v23 = vadd.f32 %v966_v48, %v324_v21  ;;  %v349_v24 = vadd.f32 %v966_v48, %v348_v22 }
  0xd3   : > { %470 = vst.msk [vmem:[%s973_s12 + $0xd0] sm:$0xff] %vm443_vm0, %v437_v20 }
  0xd4   : > { %v414_v25 = vmax.f32 %v325_v23, 0.0  ;;  %v422_v26 = vmax.f32 %v349_v24, 0.0 }
  0xd5   : > { %v372_v27 = vpop.f32.mrf.mxu2  ;;  %v396_v28 = vpop.f32.mrf.mxu3 }
  0xd6   : > { %447 = vst.msk [vmem:[%s973_s12 + $0x18] sm:$0xff] %vm443_vm0, %v414_v25  ;;  %v373_v29 = vadd.f32 %v966_v48, %v372_v27  ;;  %v397_v30 = vadd.f32 %v966_v48, %v396_v28 }
  0xd7   : > { %455 = vst.msk [vmem:[%s973_s12 + $0x58] sm:$0xff] %vm443_vm0, %v422_v26 }
  0xd8   : > { %v430_v31 = vmax.f32 %v373_v29, 0.0  ;;  %v438_v32 = vmax.f32 %v397_v30, 0.0 }
  0xd9   : > { %v327_v33 = vpop.f32.mrf.mxu0  ;;  %v351_v34 = vpop.f32.mrf.mxu1 }
  0xda   : > { %463 = vst.msk [vmem:[%s973_s12 + $0x98] sm:$0xff] %vm443_vm0, %v430_v31  ;;  %v328_v35 = vadd.f32 %v966_v48, %v327_v33  ;;  %v352_v36 = vadd.f32 %v966_v48, %v351_v34 }
  0xdb   : > { %471 = vst.msk [vmem:[%s973_s12 + $0xd8] sm:$0xff] %vm443_vm0, %v438_v32 }
  0xdc   : > { %v415_v37 = vmax.f32 %v328_v35, 0.0  ;;  %v423_v38 = vmax.f32 %v352_v36, 0.0 }
  0xdd   : > { %v375_v39 = vpop.f32.mrf.mxu2  ;;  %v399_v40 = vpop.f32.mrf.mxu3 }
  0xde   : > { %448 = vst.msk [vmem:[%s973_s12 + $0x20] sm:$0xff] %vm443_vm0, %v415_v37  ;;  %v376_v41 = vadd.f32 %v966_v48, %v375_v39  ;;  %v400_v42 = vadd.f32 %v966_v48, %v399_v40 }
  0xdf   : > { %456 = vst.msk [vmem:[%s973_s12 + $0x60] sm:$0xff] %vm443_vm0, %v423_v38 }
  0xe0   : > { %v431_v43 = vmax.f32 %v376_v41, 0.0  ;;  %v439_v44 = vmax.f32 %v400_v42, 0.0 }
  0xe1   : > { %v330_v45 = vpop.f32.mrf.mxu0  ;;  %v354_v46 = vpop.f32.mrf.mxu1 }
  0xe2   : > { %464 = vst.msk [vmem:[%s973_s12 + $0xa0] sm:$0xff] %vm443_vm0, %v431_v43  ;;  %v331_v47 = vadd.f32 %v966_v48, %v330_v45  ;;  %v355_v49 = vadd.f32 %v966_v48, %v354_v46 }
  0xe3   : > { %472 = vst.msk [vmem:[%s973_s12 + $0xe0] sm:$0xff] %vm443_vm0, %v439_v44 }
  0xe4   : > { %v416_v50 = vmax.f32 %v331_v47, 0.0  ;;  %v424_v51 = vmax.f32 %v355_v49, 0.0 }
  0xe5   : > { %v378_v52 = vpop.f32.mrf.mxu2  ;;  %v402_v53 = vpop.f32.mrf.mxu3 }
  0xe6   : > { %449 = vst.msk [vmem:[%s973_s12 + $0x28] sm:$0xff] %vm443_vm0, %v416_v50  ;;  %v379_v54 = vadd.f32 %v966_v48, %v378_v52  ;;  %v403_v55 = vadd.f32 %v966_v48, %v402_v53 }
  0xe7   : > { %457 = vst.msk [vmem:[%s973_s12 + $0x68] sm:$0xff] %vm443_vm0, %v424_v51 }
  0xe8   : > { %v432_v56 = vmax.f32 %v379_v54, 0.0  ;;  %v440_v57 = vmax.f32 %v403_v55, 0.0 }
  0xe9   : > { %v333_v58 = vpop.f32.mrf.mxu0  ;;  %v357_v59 = vpop.f32.mrf.mxu1 }
  0xea   : > { %465 = vst.msk [vmem:[%s973_s12 + $0xa8] sm:$0xff] %vm443_vm0, %v432_v56  ;;  %v334_v60 = vadd.f32 %v966_v48, %v333_v58  ;;  %v358_v61 = vadd.f32 %v966_v48, %v357_v59 }
  0xeb   : > { %473 = vst.msk [vmem:[%s973_s12 + $0xe8] sm:$0xff] %vm443_vm0, %v440_v57 }
  0xec   : > { %v417_v62 = vmax.f32 %v334_v60, 0.0  ;;  %v425_v63 = vmax.f32 %v358_v61, 0.0 }
  0xed   : > { %v381_v0 = vpop.f32.mrf.mxu2  ;;  %v405_v1 = vpop.f32.mrf.mxu3 }
  0xee   : > { %450 = vst.msk [vmem:[%s973_s12 + $0x30] sm:$0xff] %vm443_vm0, %v417_v62  ;;  %v382_v2 = vadd.f32 %v966_v48, %v381_v0  ;;  %v406_v3 = vadd.f32 %v966_v48, %v405_v1 }
  0xef   : > { %458 = vst.msk [vmem:[%s973_s12 + $0x70] sm:$0xff] %vm443_vm0, %v425_v63 }
  0xf0   : > { %v433_v4 = vmax.f32 %v382_v2, 0.0  ;;  %v441_v5 = vmax.f32 %v406_v3, 0.0 }
  0xf1   : > { %v336_v6 = vpop.f32.mrf.mxu0  ;;  %v360_v7 = vpop.f32.mrf.mxu1 }
  0xf2   : > { %466 = vst.msk [vmem:[%s973_s12 + $0xb0] sm:$0xff] %vm443_vm0, %v433_v4  ;;  %v337_v8 = vadd.f32 %v966_v48, %v336_v6  ;;  %v361_v9 = vadd.f32 %v966_v48, %v360_v7 }
  0xf3   : > { %474 = vst.msk [vmem:[%s973_s12 + $0xf0] sm:$0xff] %vm443_vm0, %v441_v5 }
  0xf4   : > { %v418_v10 = vmax.f32 %v337_v8, 0.0  ;;  %v426_v11 = vmax.f32 %v361_v9, 0.0 }
  0xf5   : > { %v384_v12 = vpop.f32.mrf.mxu2  ;;  %v408_v13 = vpop.f32.mrf.mxu3 }
  0xf6   : > { %451 = vst.msk [vmem:[%s973_s12 + $0x38] sm:$0xff] %vm443_vm0, %v418_v10  ;;  %v385_v14 = vadd.f32 %v966_v48, %v384_v12  ;;  %v409_v15 = vadd.f32 %v966_v48, %v408_v13 }
  0xf7   : > { %459 = vst.msk [vmem:[%s973_s12 + $0x78] sm:$0xff] %vm443_vm0, %v426_v11 }
  0xf8   : > { %v434_v16 = vmax.f32 %v385_v14, 0.0  ;;  %v442_v17 = vmax.f32 %v409_v15, 0.0 }
  0xfa   : > { %467 = vst.msk [vmem:[%s973_s12 + $0xb8] sm:$0xff] %vm443_vm0, %v434_v16 }
  0xfb   : > { %475 = vst.msk [vmem:[%s973_s12 + $0xf8] sm:$0xff] %vm443_vm0, %v442_v17 }
  0xfc PF: > { %s16_s17 = sadd.s32 1, %s791_s17   ;;  %s1093_s12 = smov %s775_s13 }
  0xfd   : > { %p13_p0 = scmp.ge.s32.totalorder %s16_s17, 4   ;;  %s1094_s13 = smov %s779_s14 }
  0xfe   : > { %s1095_s14 = smov %s864_s24  ;;  %s1096_s15 = smov %s787_s16 }
  0xff   : > { %s1097_s16 = smov %s1099_s19  ;;  %15 = sbr.rel (!%p13_p0) target bundleno = 4 (0x4), region = 78 }
 0x104   :  { %504 = vsyncpa [#allocation3], 1 }
 0x105   :  { %506 = vsyncpa [#allocation3 + $0x1], 1 }

</bundles_post_ra>
